<compile_context>
chip_gen: v6e
topology: v6e:2x2x1
jax: 0.10.0
libtpu: 0.0.40
codegen_flags: <defaults>
</compile_context>

<pallas_src>
import functools
import math

import jax
import jax.numpy as jnp
from jax.experimental import pallas as pl
from jax.experimental.pallas import tpu as pltpu

HARD_CONCRETE_ENDPOINTS = (-0.1, 1.1)   # pruning_cfg.hard_concrete_endpoints
_LANE = 128


def _hard_concrete_kernel(unif_ref, loc_ref, scale_ref, out_ref, *, e0, e1):
    """One lane-dense tile of fused hard-concrete sampling."""
    u = unif_ref[...]                                   # (bsz_pad, tile_n) f32
    loc = loc_ref[...]                                  # (1, tile_n), bcast over batch
    scale = scale_ref[...]                              # (1, tile_n)

    # Per-column exact 1 / (relu(scale) + 0.001); cost amortized over the batch rows.
    inv_scale = 1.0 / (jnp.maximum(scale, 0.0) + 0.001)

    # Per-element transcendentals: 2 logs + 1 tanh (sigmoid == 0.5*tanh(0.5*x)+0.5).
    log_ratio = jnp.log(0.001 + u) - jnp.log(1.0 - u)
    x = (log_ratio + loc) * inv_scale
    concrete = 0.5 * jnp.tanh(0.5 * x) + 0.5

    # Exact reference stretch: ((concrete + e0) * (e1 - e0)).clamp(0, 1).
    hard = jnp.clip((concrete + e0) * (e1 - e0), 0.0, 1.0)

    # discretize_mask(mask, 0) -> (hard > 0); hard >= 0 so hard * (hard > 0) == hard.
    # TODO(synk): prune_dangling_edges (cross-layer graph pruning) has no provided
    # source; it is treated as identity on the discretized mask.
    out_ref[...] = hard.astype(out_ref.dtype)


def _pick_tile(n_128, bsz_pad):
    """Largest lane tile that fits a conservative VMEM budget; >=2 tiles when possible."""
    vmem_budget = 16 * 1024 * 1024
    # double-buffered (unif in + mask out) f32 tiles + loc/scale rows, per lane
    bytes_per_lane = 2 * (2 * bsz_pad * 4 + 2 * 4)
    max_tile = (vmem_budget // bytes_per_lane) // _LANE * _LANE
    max_tile = max(_LANE, min(32 * 1024, max_tile))
    if n_128 <= max_tile:
        if n_128 >= 2 * _LANE:
            # >=2 "parallel" grid programs so both v7x TensorCores get work.
            return (n_128 // 2 + _LANE - 1) // _LANE * _LANE
        return n_128
    return max_tile


def _run_fused_kernel(unif, loc_row, scale_row, tile_n,
                      endpoints=HARD_CONCRETE_ENDPOINTS):
    """unif: (bsz_pad, n_pad) f32; loc_row/scale_row: (1, n_pad) f32 -> (bsz_pad, n_pad) f32."""
    bsz_pad, n_pad = unif.shape
    kernel = functools.partial(_hard_concrete_kernel,
                               e0=float(endpoints[0]), e1=float(endpoints[1]))
    return pl.pallas_call(
        kernel,
        out_shape=jax.ShapeDtypeStruct((bsz_pad, n_pad), jnp.float32),
        grid_spec=pltpu.PrefetchScalarGridSpec(
            num_scalar_prefetch=0,
            grid=(n_pad // tile_n,),
            in_specs=[
                pl.BlockSpec((bsz_pad, tile_n), lambda j: (0, j)),
                pl.BlockSpec((1, tile_n), lambda j: (0, j)),
                pl.BlockSpec((1, tile_n), lambda j: (0, j)),
            ],
            out_specs=pl.BlockSpec((bsz_pad, tile_n), lambda j: (0, j)),
        ),
        compiler_params=pltpu.CompilerParams(
            dimension_semantics=("parallel",)),
    )(unif, loc_row, scale_row)


def get_sampling_params(sampling_params):
    """torch: cat([ts.flatten(0, -2) if ndim>1 else ts[None] for ...], dim=0)."""
    flats = []
    for k in sampling_params:
        for ts in sampling_params[k]:
            flats.append(ts.reshape(-1, ts.shape[-1]) if ts.ndim > 1 else ts[None, :])
    return jnp.concatenate(flats, axis=0)


def edge_mask_joint_sampler_forward(sampling_params, bsz, rng_key):
    """Returns (sampled_mask dict, concatenated sampling params)."""
    # Fuse every (..., 2) parameter tensor along the lane axis; each segment start is
    # 128-aligned so the per-tensor output slices stay lane-aligned (no relayout copies).
    layout = []                       # (key, mask_shape, n_elems, lane_offset)
    loc_parts, scale_parts = [], []
    off = 0
    for k in sampling_params:
        for ts in sampling_params[k]:
            mask_shape = ts.shape[:-1]
            n = int(math.prod(mask_shape)) if mask_shape else 1
            flat = ts.reshape(-1, 2).astype(jnp.float32)
            n_al = (n + _LANE - 1) // _LANE * _LANE
            loc_parts.append(jnp.pad(flat[:, 0], (0, n_al - n)))
            scale_parts.append(jnp.pad(flat[:, 1], (0, n_al - n), constant_values=1.0))
            layout.append((k, mask_shape, n, off))
            off += n_al
    n_128 = off

    bsz_pad = bsz if bsz % 8 == 0 else (bsz + 7) // 8 * 8
    tile_n = _pick_tile(n_128, bsz_pad)
    n_pad = (n_128 + tile_n - 1) // tile_n * tile_n

    loc_row = jnp.pad(jnp.concatenate(loc_parts), (0, n_pad - n_128))[None, :]
    scale_row = jnp.pad(jnp.concatenate(scale_parts), (0, n_pad - n_128),
                        constant_values=1.0)[None, :]

    # One fused U[0,1) draw (reference draws one uniform per mask element).
    unif = jax.random.uniform(rng_key, (bsz_pad, n_pad), dtype=jnp.float32)

    fused = _run_fused_kernel(unif, loc_row, scale_row, tile_n)

    # Slice each tensor's segment directly from the padded kernel output
    # (128-aligned starts; no full-array [:bsz, :n] re-materialization).
    sampled_mask = {k: [] for k in sampling_params}
    for k, mask_shape, n, seg_off in layout:
        sampled_mask[k].append(
            fused[:bsz, seg_off:seg_off + n].reshape((bsz,) + mask_shape))
    return sampled_mask, get_sampling_params(sampling_params)


if __name__ == "__main__":
    # pruning_cfg: n_samples=2, batch_size=4 -> bsz=8
    n_samples, batch_size = 2, 4
    bsz = n_samples * batch_size

    root = jax.random.PRNGKey(0)
    k_attn, k_mlp0, k_mlp1, k_rng = jax.random.split(root, 4)

    # init_params: trailing dim of 2 = (location, scale); scale init 2/3 (fix_nans value).
    def init_param(key, shape):
        loc = jax.random.normal(key, shape + (1,), dtype=jnp.float32)
        scale = jnp.full(shape + (1,), 2.0 / 3.0, jnp.float32)
        return jnp.concatenate([loc, scale], axis=-1)

    sampling_params = {
        "attn-attn": [init_param(k_attn, (4, 8))],        # (layers=4, heads=8, 2)
        "mlp-attn": [init_param(k_mlp0, (4,)),            # (layers=4, 2)
                     init_param(k_mlp1, (4,))],
    }

    forward = jax.jit(edge_mask_joint_sampler_forward, static_argnums=(1,))
    sampled_mask, params_cat = forward(sampling_params, bsz, k_rng)

    jax.block_until_ready(params_cat)
    for k in sampled_mask:
        for m in sampled_mask[k]:
            jax.block_until_ready(m)

    # Sanity checks (shapes / value range of hard-concrete samples).
    assert params_cat.shape == (4 * 8 + 4 + 4, 2)
    assert sampled_mask["attn-attn"][0].shape == (bsz, 4, 8)
    assert sampled_mask["mlp-attn"][0].shape == (bsz, 4)
    assert sampled_mask["mlp-attn"][1].shape == (bsz, 4)
    for k in sampled_mask:
        for m in sampled_mask[k]:
            assert bool(jnp.all(jnp.isfinite(m)))
            assert bool(jnp.all(m >= 0.0)) and bool(jnp.all(m <= 1.0))

    print("KERNEL_OK")
</pallas_src>

<mosaic_0001>
module attributes {stable_mosaic.version = 11 : i64} {
  func.func @_hard_concrete_kernel(%arg0: i32, %arg1: memref<8x256xf32, #tpu.memory_space<vmem>>, %arg2: memref<1x256xf32, #tpu.memory_space<vmem>>, %arg3: memref<1x256xf32, #tpu.memory_space<vmem>>, %arg4: memref<8x256xf32, #tpu.memory_space<vmem>>) attributes {dimension_semantics = [#tpu.dimension_semantics<parallel>], iteration_bounds = array<i64: 2>, scalar_prefetch = 0 : i64, scratch_operands = 0 : i64, tpu.core_type = #tpu.core_type<tc>, window_params = [{transform_indices = @transform_0, window_bounds = array<i64: 8, 256>}, {transform_indices = @transform_1, window_bounds = array<i64: 1, 256>}, {transform_indices = @transform_2, window_bounds = array<i64: 1, 256>}, {transform_indices = @transform_3, window_bounds = array<i64: 8, 256>}]} {
    %c0 = arith.constant 0 : index
    %c0_0 = arith.constant 0 : index
    %0 = vector.load %arg1[%c0, %c0_0] : memref<8x256xf32, #tpu.memory_space<vmem>>, vector<8x256xf32>
    %c0_1 = arith.constant 0 : index
    %c0_2 = arith.constant 0 : index
    %1 = vector.load %arg2[%c0_1, %c0_2] : memref<1x256xf32, #tpu.memory_space<vmem>>, vector<1x256xf32>
    %c0_3 = arith.constant 0 : index
    %c0_4 = arith.constant 0 : index
    %2 = vector.load %arg3[%c0_3, %c0_4] : memref<1x256xf32, #tpu.memory_space<vmem>>, vector<1x256xf32>
    %cst = arith.constant 0.000000e+00 : f32
    %3 = vector.broadcast %cst : f32 to vector<1x256xf32>
    %4 = arith.maximumf %2, %3 : vector<1x256xf32>
    %cst_5 = arith.constant 1.000000e-03 : f32
    %5 = vector.broadcast %cst_5 : f32 to vector<1x256xf32>
    %6 = arith.addf %4, %5 : vector<1x256xf32>
    %cst_6 = arith.constant 1.000000e+00 : f32
    %7 = vector.broadcast %cst_6 : f32 to vector<1x256xf32>
    %8 = arith.divf %7, %6 : vector<1x256xf32>
    %cst_7 = arith.constant 1.000000e-03 : f32
    %9 = vector.broadcast %cst_7 : f32 to vector<8x256xf32>
    %10 = arith.addf %9, %0 : vector<8x256xf32>
    %11 = math.log %10 : vector<8x256xf32>
    %cst_8 = arith.constant 1.000000e+00 : f32
    %12 = vector.broadcast %cst_8 : f32 to vector<8x256xf32>
    %13 = arith.subf %12, %0 : vector<8x256xf32>
    %14 = math.log %13 : vector<8x256xf32>
    %15 = arith.subf %11, %14 : vector<8x256xf32>
    %16 = vector.broadcast %1 : vector<1x256xf32> to vector<8x256xf32>
    %17 = arith.addf %15, %16 : vector<8x256xf32>
    %18 = vector.broadcast %8 : vector<1x256xf32> to vector<8x256xf32>
    %19 = arith.mulf %17, %18 : vector<8x256xf32>
    %cst_9 = arith.constant 5.000000e-01 : f32
    %20 = vector.broadcast %cst_9 : f32 to vector<8x256xf32>
    %21 = arith.mulf %20, %19 : vector<8x256xf32>
    %22 = math.tanh %21 : vector<8x256xf32>
    %cst_10 = arith.constant 5.000000e-01 : f32
    %23 = vector.broadcast %cst_10 : f32 to vector<8x256xf32>
    %24 = arith.mulf %23, %22 : vector<8x256xf32>
    %cst_11 = arith.constant 5.000000e-01 : f32
    %25 = vector.broadcast %cst_11 : f32 to vector<8x256xf32>
    %26 = arith.addf %24, %25 : vector<8x256xf32>
    %cst_12 = arith.constant -1.000000e-01 : f32
    %27 = vector.broadcast %cst_12 : f32 to vector<8x256xf32>
    %28 = arith.addf %26, %27 : vector<8x256xf32>
    %cst_13 = arith.constant 1.200000e+00 : f32
    %29 = vector.broadcast %cst_13 : f32 to vector<8x256xf32>
    %30 = arith.mulf %28, %29 : vector<8x256xf32>
    %cst_14 = arith.constant 0.000000e+00 : f32
    %cst_15 = arith.constant 1.000000e+00 : f32
    %31 = vector.broadcast %cst_14 : f32 to vector<8x256xf32>
    %32 = arith.maximumf %31, %30 : vector<8x256xf32>
    %33 = vector.broadcast %cst_15 : f32 to vector<8x256xf32>
    %34 = arith.minimumf %33, %32 : vector<8x256xf32>
    %c0_16 = arith.constant 0 : index
    %c0_17 = arith.constant 0 : index
    %35 = vector.load %arg4[%c0_16, %c0_17] : memref<8x256xf32, #tpu.memory_space<vmem>>, vector<8x256xf32>
    tpu.vector_store %arg4[%c0_16, %c0_17], %34 {strides = array<i32>} : memref<8x256xf32, #tpu.memory_space<vmem>>, vector<8x256xf32>,
    return
  }
  func.func @transform_0(%arg0: i32) -> (i32, i32) {
    %c0_i32 = arith.constant 0 : i32
    %c0_i32_0 = arith.constant 0 : i32
    return %c0_i32, %arg0 : i32, i32
  }
  func.func @transform_1(%arg0: i32) -> (i32, i32) {
    %c0_i32 = arith.constant 0 : i32
    %c0_i32_0 = arith.constant 0 : i32
    return %c0_i32, %arg0 : i32, i32
  }
  func.func @transform_2(%arg0: i32) -> (i32, i32) {
    %c0_i32 = arith.constant 0 : i32
    %c0_i32_0 = arith.constant 0 : i32
    return %c0_i32, %arg0 : i32, i32
  }
  func.func @transform_3(%arg0: i32) -> (i32, i32) {
    %c0_i32 = arith.constant 0 : i32
    %c0_i32_0 = arith.constant 0 : i32
    return %c0_i32, %arg0 : i32, i32
  }
}

</mosaic_0001>

<bundles_post_ra>
// kernel: edge_mask_joint_sampler_forward.1
= control target key start
LH: loop header
LB: loop body
LE: loop exit
PB: predicated region body
PF: predicated region fallthrough
CT: control target
= control target key end

     0   :  { %s415_s12 = smov 0   ;;  %s447_s0 = inlined_call_operand.vmem [shape: f32[8,512], index: 0, kind: input, shape index: {}]   ;;  %s448_s1 = inlined_call_operand.vmem [shape: f32[1,512], index: 1, kind: input, shape index: {}]   ;;  %s449_s2 = inlined_call_operand.vmem [shape: f32[1,512], index: 2, kind: input, shape index: {}]   ;;  %s450_s3 = inlined_call_operand.vmem [shape: f32[8,512], index: 3, kind: output, shape index: {}]  }
   0x1 LB: > { %s352_s13 = sadd.s32 4294967295, %s393_s12   ;;  %p356_p0 = scmp.ge.s32.totalorder %s393_s12, 1  ;;  %s393_s12 = sphi %s415_s12, %s13_s12  }
   0x2   : > { %p158_p1 = scmp.lt.s32.totalorder %s393_s12, 3 }
   0x4   : > { %p159_p2 = pnand %p356_p0, %p158_p1 }
   0x5   : > { %s357_s14 = sshll.u32 (!%p159_p2), %s352_s13, 1 }
   0x6   : > { %162 = sbr.rel (%p159_p2) target bundleno = 72 (0x48), region = 32  ;;  %p191_p3 = scmp.lt.s32.totalorder (!%p159_p2), %s357_s14, 3 }
   0xb   : > { %s452_s14 = smov (!%p191_p3, %s357_s14), 3  ;;  %v235_v9 = vlaneseq }
   0xc   : > { %s358_s15 = sshll.u32 %s452_s14, 3  ;;  %s204_s21 = scalar_lea.vmem %s449_s2, %s452_s14 }
   0xd   : > { %s194_s18 = scalar_lea.vmem %s447_s0, %s358_s15  ;;  %v215_v2 = vld [vmem:[%s204_s21] sm:$0x3]  ;;  %v236_v10 = vshrl.u32 %v235_v9, 7  ;;  %s199_s24 = scalar_lea.vmem %s448_s1, %s452_s14 }
   0xe   : > { %v212_v0 = vld [vmem:[%s194_s18] sm:$0xff]  ;;  %v213_v1 = vld [vmem:[%s194_s18 + $0x8] sm:$0xff]  ;;  %v216_v3 = vmax.f32 %v215_v2, 0.0  ;;  %s210_s27 = scalar_lea.vmem %s450_s3, %s358_s15 }
   0xf   : > { %v220_v4 = vadd.f32 0.001, %v212_v0  ;;  %v221_v5 = vadd.f32 0.001, %v213_v1  ;;  %v226_v6 = vsub.f32 1.0, %v212_v0  ;;  %v227_v8 = vsub.f32 1.0, %v213_v1 }
  0x10   : > { %v217_v7 = vadd.f32 0.001, %v216_v3  ;;  %v237_v12 = vsub.s32 0, %v236_v10  ;;  %v214_v14 = vld [vmem:[%s199_s24] sm:$0x3]  ;;  %v241_v15 = vsub.s32 1, %v236_v10 }
  0x11   : > { %373 = vlog2.f32 %v220_v4 }
  0x12   : > { %375 = vlog2.f32 %v221_v5  ;;  %v238_v22 = vrot.slane %v214_v14, %v237_v12  ;;  %v242_v24 = vrot.slane %v214_v14, %v241_v15 }
  0x13   : > { %377 = vrcp.f32 %v217_v7 }
  0x14   : > { %379 = vlog2.f32 %v226_v6 }
  0x15   : > { %381 = vlog2.f32 %v227_v8 }
  0x1e   : > { %v374_v11 = vpop.eup %373 }
  0x1f   : > { %v376_v13 = vpop.eup %375  ;;  %v223_v17 = vmul.f32 0.6931472, %v374_v11 }
  0x20   : > { %v378_v16 = vpop.eup %377  ;;  %v225_v19 = vmul.f32 0.6931472, %v376_v13 }
  0x21   : > { %v380_v18 = vpop.eup %379  ;;  %v251_v26 = vrot.slane %v378_v16, %v237_v12  ;;  %v255_v28 = vrot.slane %v378_v16, %v241_v15 }
  0x22   : > { %v382_v20 = vpop.eup %381  ;;  %v229_v21 = vmul.f32 0.6931472, %v380_v18 }
  0x23   : > { %v231_v23 = vmul.f32 0.6931472, %v382_v20 }
  0x24   : > { %v232_v25 = vsub.f32 %v223_v17, %v229_v21 }
  0x25   : > { %v233_v27 = vsub.f32 %v225_v19, %v231_v23 }
  0x26   : > { %v245_v29 = vadd.f32 %v238_v22, %v232_v25 }
  0x27   : > { %v246_v30 = vadd.f32 %v242_v24, %v233_v27 }
  0x28   : > { %v258_v31 = vmul.f32 %v251_v26, %v245_v29 }
  0x29   : > { %v259_v32 = vmul.f32 %v255_v28, %v246_v30 }
  0x2a   : > { %v260_v33 = vmul.f32 0.5, %v258_v31 }
  0x2b   : > { %v261_v34 = vmul.f32 0.5, %v259_v32 }
  0x2c   : > { %383 = vtanh.f32 %v260_v33 }
  0x2d   : > { %385 = vtanh.f32 %v261_v34 }
  0x39   : > { %v384_v35 = vpop.eup %383 }
  0x3a   : > { %v386_v36 = vpop.eup %385  ;;  %v264_v37 = vmul.f32 0.5, %v384_v35 }
  0x3b   : > { %v265_v38 = vmul.f32 0.5, %v386_v36 }
  0x3c   : > { %v266_v39 = vadd.f32 0.5, %v264_v37 }
  0x3d   : > { %v267_v40 = vadd.f32 0.5, %v265_v38 }
  0x3e   : > { %v268_v41 = vadd.f32 -0.1, %v266_v39 }
  0x3f   : > { %v269_v42 = vadd.f32 -0.1, %v267_v40 }
  0x40   : > { %v270_v43 = vmul.f32 1.2, %v268_v41 }
  0x41   : > { %v271_v44 = vmul.f32 1.2, %v269_v42 }
  0x42   : > { %v272_v45 = vmax.f32 %v270_v43, 0.0 }
  0x43   : > { %v273_v46 = vmax.f32 %v271_v44, 0.0 }
  0x44   : > { %v274_v47 = vmin.f32 %v272_v45, 1.0 }
  0x45   : > { %v275_v48 = vmin.f32 %v273_v46, 1.0 }
  0x46   : > { %276 = vst [vmem:[%s210_s27] sm:$0xff] %v274_v47 }
  0x47   : > { %277 = vst [vmem:[%s210_s27 + $0x8] sm:$0xff] %v275_v48 }
  0x48 PF: > { %s13_s12 = sadd.s32 1, %s393_s12  }
  0x49   : > { %p10_p4 = scmp.ge.s32.totalorder %s13_s12, 4  }
  0x4b   :  { %12 = sbr.rel (!%p10_p4) target bundleno = 1 (0x1), region = 68 }

</bundles_post_ra>
